<compile_context>
chip_gen: v6e
topology: v6e:2x2x1
jax: 0.10.0
libtpu: 0.0.40
codegen_flags: <defaults>
</compile_context>

<pallas_src>
import functools

import jax
import jax.numpy as jnp
from jax.experimental import pallas as pl
from jax.experimental.pallas import tpu as pltpu


def _attention_gate_kernel(g_ref, s_ref,
                           wg_ref, ws_ref, bgs_ref,
                           wo_ref, bo_ref,
                           out_ref, *, approx_sigmoid):
    """One (batch, pixel-tile) grid step, channel-major.

    g_ref : (Cg, T)   gating-signal pixels (channels on sublanes, pixels on lanes)
    s_ref : (Cs, T)   skip-connection pixels
    wg    : (Co, Cg)  folded conv1x1+BN weight for g   (compute dtype)
    ws    : (Co, Cs)  folded conv1x1+BN weight for s   (compute dtype)
    bgs   : (Co, 1)   bg_folded + bs_folded, f32 (pre-summed in wrapper)
    wo    : (Co, Co)  output conv1x1 weight            (compute dtype)
    bo    : (Co, 1)   output conv1x1 bias, f32
    out   : (Cs, T)   sigmoid(Wo(relu(Wg g + Ws s))) * s   (requires Co == Cs)
    """
    g = g_ref[...]            # native dtype straight into the MXU
    s = s_ref[...]

    # Wg(g) + Ws(s) + (bg + bs); BN already folded. f32 accumulation.
    a = jnp.dot(wg_ref[...], g, preferred_element_type=jnp.float32)
    a = a + jnp.dot(ws_ref[...], s, preferred_element_type=jnp.float32)
    a = jnp.maximum(a + bgs_ref[...], 0.0)                      # ReLU (f32)

    # output 1x1 conv + sigmoid (feed the MXU in the weight dtype).
    a = a.astype(wo_ref.dtype)
    att = jnp.dot(wo_ref[...], a, preferred_element_type=jnp.float32) + bo_ref[...]
    if approx_sigmoid:
        # exp on EUP; approx reciprocal also on EUP -> divide off the VALU.
        att = pl.reciprocal(1.0 + jnp.exp(-att), approx=True)
    else:
        att = jax.nn.sigmoid(att)

    # gate the skip connection (f32 * native promotes to f32, then cast once).
    out_ref[...] = (att * s).astype(out_ref.dtype)


def _fold_bn(w, b, gamma, beta, mean, var, eps=1e-5):
    """Fold eval-mode BatchNorm into a 1x1 conv.  w: (Cout, Cin), b: (Cout,)."""
    scale = gamma / jnp.sqrt(var + eps)
    w_eff = w * scale[:, None]
    b_eff = (b - mean) * scale + beta
    return w_eff, b_eff


def _choose_tile_hw(HW, Cg, Cs, N, itemsize, max_tile_hw, pipelined_vmem_budget):
    """Channel-aware, lane-dense pixel tile; guarantees >=2 grid steps if possible."""
    # Double-buffered g + s + out blocks per pixel column.
    bytes_per_pixel = (Cg + 2 * Cs) * itemsize * 2
    budget_tile = max(pipelined_vmem_budget // max(bytes_per_pixel, 1), 128)
    tile = min(max_tile_hw, budget_tile)
    tile = max(128, (tile // 128) * 128)          # lane-dense
    if HW <= tile:
        tile = HW                                  # full extent (always legal)
    # Keep both v7x TensorCores busy: force >=2 steps on a parallel axis.
    if N * pl.cdiv(HW, tile) < 2 and HW > 256:
        half = -(-HW // 2)
        half = ((half + 127) // 128) * 128
        if half < HW:
            tile = half
    return tile


@functools.partial(jax.jit, static_argnames=("max_tile_hw",
                                              "pipelined_vmem_budget",
                                              "approx_sigmoid"))
def attention_gate_forward(g, s, params, max_tile_hw=4096,
                           pipelined_vmem_budget=12 * 1024 * 1024,
                           approx_sigmoid=False):
    """g: (N, Cg, H, W), s: (N, Cs, H, W)  ->  (N, Cs, H, W) in s/g dtype."""
    N, Cg, H, W = g.shape
    Ns, Cs, Hs, Ws_ = s.shape
    Co = params["wo"].shape[0]
    assert (Ns, Hs, Ws_) == (N, H, W), "g and s must share batch/spatial dims"
    assert Co == Cs, "attention_gate requires out_c == in_c[1] for `out * s`"

    compute_dtype = g.dtype
    s = s.astype(compute_dtype)

    # Fold BN into the two input 1x1 convs (in f32 for accuracy), pre-sum biases,
    # then cast weights to the activation dtype so the MXU runs native passes.
    wg, bg = _fold_bn(params["wg"].astype(jnp.float32), params["bg"].astype(jnp.float32),
                      params["g_gamma"].astype(jnp.float32), params["g_beta"].astype(jnp.float32),
                      params["g_mean"].astype(jnp.float32), params["g_var"].astype(jnp.float32))
    ws, bs = _fold_bn(params["ws"].astype(jnp.float32), params["bs"].astype(jnp.float32),
                      params["s_gamma"].astype(jnp.float32), params["s_beta"].astype(jnp.float32),
                      params["s_mean"].astype(jnp.float32), params["s_var"].astype(jnp.float32))
    b_gs = (bg + bs).reshape(Co, 1)                               # f32, tiny
    b_o = params["bo"].astype(jnp.float32).reshape(Co, 1)         # f32, tiny
    wg = wg.astype(compute_dtype)
    ws = ws.astype(compute_dtype)
    wo = params["wo"].astype(compute_dtype)

    # Channel-major views: (N, C, H*W).  Pure metadata reshape, no HBM copy.
    HW = H * W
    g3 = g.reshape(N, Cg, HW)
    s3 = s.reshape(N, Cs, HW)

    itemsize = jnp.dtype(compute_dtype).itemsize
    tile_hw = _choose_tile_hw(HW, Cg, Cs, N, itemsize,
                              max_tile_hw, pipelined_vmem_budget)
    grid = (N, pl.cdiv(HW, tile_hw))

    # Explicit VMEM limit: pipelined blocks (budget-bounded) + resident weights.
    weight_bytes = (Co * Cg + Co * Cs + Co * Co) * itemsize + 2 * Co * 4
    vmem_limit = max(32 * 1024 * 1024,
                     2 * (Cg + 2 * Cs) * tile_hw * itemsize
                     + 2 * weight_bytes + (2 << 20))

    full = lambda b, j: (0, 0)  # weights / biases: one resident block

    kernel = functools.partial(_attention_gate_kernel,
                               approx_sigmoid=approx_sigmoid)

    out3 = pl.pallas_call(
        kernel,
        out_shape=jax.ShapeDtypeStruct((N, Cs, HW), compute_dtype),
        grid_spec=pltpu.PrefetchScalarGridSpec(
            num_scalar_prefetch=0,
            grid=grid,
            in_specs=[
                pl.BlockSpec((None, Cg, tile_hw), lambda b, j: (b, 0, j)),  # g
                pl.BlockSpec((None, Cs, tile_hw), lambda b, j: (b, 0, j)),  # s
                pl.BlockSpec((Co, Cg), full),                               # wg
                pl.BlockSpec((Co, Cs), full),                               # ws
                pl.BlockSpec((Co, 1), full),                                # bg+bs
                pl.BlockSpec((Co, Co), full),                               # wo
                pl.BlockSpec((Co, 1), full),                                # bo
            ],
            out_specs=pl.BlockSpec((None, Cs, tile_hw), lambda b, j: (b, 0, j)),
        ),
        compiler_params=pltpu.CompilerParams(
            dimension_semantics=("parallel", "parallel"),
            vmem_limit_bytes=int(vmem_limit)),
    )(g3, s3, wg, ws, b_gs, wo, b_o)

    return out3.reshape(N, Cs, H, W)


def init_params(key, in_c, out_c, dtype=jnp.float32):
    """Deterministic parameters matching attention_gate.__init__ shapes.

    Conv weights are stored PyTorch-style (Cout, Cin) (kernel_size=1 squeezed).
    """
    cg, cs = in_c
    ks = jax.random.split(key, 6)
    p = {
        "wg": jax.random.normal(ks[0], (out_c, cg), dtype) * 0.1,
        "bg": jax.random.normal(ks[1], (out_c,), dtype) * 0.1,
        "ws": jax.random.normal(ks[2], (out_c, cs), dtype) * 0.1,
        "bs": jax.random.normal(ks[3], (out_c,), dtype) * 0.1,
        "wo": jax.random.normal(ks[4], (out_c, out_c), dtype) * 0.1,
        "bo": jax.random.normal(ks[5], (out_c,), dtype) * 0.1,
        # BatchNorm affine + running stats (eval semantics); non-trivial values
        # so the fold is actually exercised.
        "g_gamma": jnp.linspace(0.9, 1.1, out_c, dtype=dtype),
        "g_beta": jnp.linspace(-0.05, 0.05, out_c, dtype=dtype),
        "g_mean": jnp.linspace(-0.1, 0.1, out_c, dtype=dtype),
        "g_var": jnp.linspace(0.8, 1.2, out_c, dtype=dtype),
        "s_gamma": jnp.linspace(1.1, 0.9, out_c, dtype=dtype),
        "s_beta": jnp.linspace(0.05, -0.05, out_c, dtype=dtype),
        "s_mean": jnp.linspace(0.1, -0.1, out_c, dtype=dtype),
        "s_var": jnp.linspace(1.2, 0.8, out_c, dtype=dtype),
    }
    return p


def _reference(g, s, params):
    """Pure-JAX f32 reference of the same forward (sanity check)."""
    wg, bg = _fold_bn(params["wg"], params["bg"], params["g_gamma"],
                      params["g_beta"], params["g_mean"], params["g_var"])
    ws, bs = _fold_bn(params["ws"], params["bs"], params["s_gamma"],
                      params["s_beta"], params["s_mean"], params["s_var"])
    gh = jnp.einsum("nchw,oc->nohw", g, wg) + bg[None, :, None, None]
    sh = jnp.einsum("nchw,oc->nohw", s, ws) + bs[None, :, None, None]
    a = jax.nn.relu(gh + sh)
    att = jax.nn.sigmoid(jnp.einsum("nchw,oc->nohw", a, params["wo"])
                         + params["bo"][None, :, None, None])
    return att * s


if __name__ == "__main__":
    key = jax.random.PRNGKey(0)
    k_g, k_s, k_p = jax.random.split(key, 3)

    # Small shapes consistent with the module: in_c = (4, 8), out_c = 8
    # (out_c must equal in_c[1] for the final `out * s`).
    N, H, W = 2, 16, 16
    in_c, out_c = (4, 8), 8

    g32 = jax.random.normal(k_g, (N, in_c[0], H, W), jnp.float32)
    s32 = jax.random.normal(k_s, (N, in_c[1], H, W), jnp.float32)
    params = init_params(k_p, in_c, out_c)

    ref = _reference(g32, s32, params)

    # 1) f32 path: exact-semantics check against the reference.
    out32 = attention_gate_forward(g32, s32, params)
    jax.block_until_ready(out32)
    assert out32.shape == (N, in_c[1], H, W)
    assert jnp.allclose(out32, ref, atol=1e-4, rtol=1e-4), (
        float(jnp.max(jnp.abs(out32 - ref))))

    # 2) bf16 path (perf-recommended): halved HBM traffic, native-bf16 MXU,
    #    EUP sigmoid; validated at bf16-appropriate tolerance.
    g16 = g32.astype(jnp.bfloat16)
    s16 = s32.astype(jnp.bfloat16)
    out16 = attention_gate_forward(g16, s16, params, approx_sigmoid=True)
    jax.block_until_ready(out16)
    assert out16.dtype == jnp.bfloat16
    assert jnp.allclose(out16.astype(jnp.float32), ref, atol=6e-2, rtol=6e-2), (
        float(jnp.max(jnp.abs(out16.astype(jnp.float32) - ref))))

    print("KERNEL_OK")
</pallas_src>

<mosaic_0001>
module attributes {stable_mosaic.version = 11 : i64} {
  func.func @_attention_gate_kernel(%arg0: i32, %arg1: i32, %arg2: memref<1x4x256xf32, #tpu.memory_space<vmem>>, %arg3: memref<1x8x256xf32, #tpu.memory_space<vmem>>, %arg4: memref<8x4xf32, #tpu.memory_space<vmem>>, %arg5: memref<8x8xf32, #tpu.memory_space<vmem>>, %arg6: memref<8x1xf32, #tpu.memory_space<vmem>>, %arg7: memref<8x8xf32, #tpu.memory_space<vmem>>, %arg8: memref<8x1xf32, #tpu.memory_space<vmem>>, %arg9: memref<1x8x256xf32, #tpu.memory_space<vmem>>) attributes {dimension_semantics = [#tpu.dimension_semantics<parallel>, #tpu.dimension_semantics<parallel>], iteration_bounds = array<i64: 2, 1>, scalar_prefetch = 0 : i64, scratch_operands = 0 : i64, tpu.core_type = #tpu.core_type<tc>, window_params = [{transform_indices = @transform_0, window_bounds = array<i64: 1, 4, 256>}, {transform_indices = @transform_1, window_bounds = array<i64: 1, 8, 256>}, {pipeline_mode = #tpu.pipeline_mode<synchronous>, transform_indices = @transform_2, window_bounds = array<i64: 8, 4>}, {pipeline_mode = #tpu.pipeline_mode<synchronous>, transform_indices = @transform_3, window_bounds = array<i64: 8, 8>}, {pipeline_mode = #tpu.pipeline_mode<synchronous>, transform_indices = @transform_4, window_bounds = array<i64: 8, 1>}, {pipeline_mode = #tpu.pipeline_mode<synchronous>, transform_indices = @transform_5, window_bounds = array<i64: 8, 8>}, {pipeline_mode = #tpu.pipeline_mode<synchronous>, transform_indices = @transform_6, window_bounds = array<i64: 8, 1>}, {transform_indices = @transform_7, window_bounds = array<i64: 1, 8, 256>}]} {
    %c0 = arith.constant 0 : index
    %c0_0 = arith.constant 0 : index
    %c0_1 = arith.constant 0 : index
    %0 = vector.load %arg2[%c0, %c0_0, %c0_1] : memref<1x4x256xf32, #tpu.memory_space<vmem>>, vector<1x4x256xf32>
    %1 = vector.shape_cast %0 : vector<1x4x256xf32> to vector<4x256xf32>
    %c0_2 = arith.constant 0 : index
    %c0_3 = arith.constant 0 : index
    %c0_4 = arith.constant 0 : index
    %2 = vector.load %arg3[%c0_2, %c0_3, %c0_4] : memref<1x8x256xf32, #tpu.memory_space<vmem>>, vector<1x8x256xf32>
    %3 = vector.shape_cast %2 : vector<1x8x256xf32> to vector<8x256xf32>
    %c0_5 = arith.constant 0 : index
    %c0_6 = arith.constant 0 : index
    %4 = vector.load %arg4[%c0_5, %c0_6] : memref<8x4xf32, #tpu.memory_space<vmem>>, vector<8x4xf32>
    %cst = arith.constant dense<0.000000e+00> : vector<8x256xf32>
    %5 = tpu.matmul %4, %1, %cst {dimension_numbers = #tpu.dot_dimension_numbers<[1], [0], [0], [1], [0, 0, 1, 1], [], []>} : vector<8x4xf32>, vector<4x256xf32>, vector<8x256xf32> -> vector<8x256xf32>
    %c0_7 = arith.constant 0 : index
    %c0_8 = arith.constant 0 : index
    %6 = vector.load %arg5[%c0_7, %c0_8] : memref<8x8xf32, #tpu.memory_space<vmem>>, vector<8x8xf32>
    %cst_9 = arith.constant dense<0.000000e+00> : vector<8x256xf32>
    %7 = tpu.matmul %6, %3, %cst_9 {dimension_numbers = #tpu.dot_dimension_numbers<[1], [0], [0], [1], [0, 0, 1, 1], [], []>} : vector<8x8xf32>, vector<8x256xf32>, vector<8x256xf32> -> vector<8x256xf32>
    %8 = arith.addf %5, %7 : vector<8x256xf32>
    %c0_10 = arith.constant 0 : index
    %c0_11 = arith.constant 0 : index
    %9 = vector.load %arg6[%c0_10, %c0_11] : memref<8x1xf32, #tpu.memory_space<vmem>>, vector<8x1xf32>
    %10 = vector.broadcast %9 : vector<8x1xf32> to vector<8x256xf32>
    %11 = arith.addf %8, %10 : vector<8x256xf32>
    %cst_12 = arith.constant 0.000000e+00 : f32
    %12 = vector.broadcast %cst_12 : f32 to vector<8x256xf32>
    %13 = arith.maximumf %11, %12 : vector<8x256xf32>
    %c0_13 = arith.constant 0 : index
    %c0_14 = arith.constant 0 : index
    %14 = vector.load %arg7[%c0_13, %c0_14] : memref<8x8xf32, #tpu.memory_space<vmem>>, vector<8x8xf32>
    %cst_15 = arith.constant dense<0.000000e+00> : vector<8x256xf32>
    %15 = tpu.matmul %14, %13, %cst_15 {dimension_numbers = #tpu.dot_dimension_numbers<[1], [0], [0], [1], [0, 0, 1, 1], [], []>} : vector<8x8xf32>, vector<8x256xf32>, vector<8x256xf32> -> vector<8x256xf32>
    %c0_16 = arith.constant 0 : index
    %c0_17 = arith.constant 0 : index
    %16 = vector.load %arg8[%c0_16, %c0_17] : memref<8x1xf32, #tpu.memory_space<vmem>>, vector<8x1xf32>
    %17 = vector.broadcast %16 : vector<8x1xf32> to vector<8x256xf32>
    %18 = arith.addf %15, %17 : vector<8x256xf32>
    %19 = arith.negf %18 : vector<8x256xf32>
    %20 = math.exp %19 : vector<8x256xf32>
    %cst_18 = arith.constant 1.000000e+00 : f32
    %21 = vector.broadcast %cst_18 : f32 to vector<8x256xf32>
    %22 = arith.addf %21, %20 : vector<8x256xf32>
    %23 = arith.divf %21, %22 : vector<8x256xf32>
    %24 = arith.mulf %23, %3 : vector<8x256xf32>
    %c0_19 = arith.constant 0 : index
    %c0_20 = arith.constant 0 : index
    %c0_21 = arith.constant 0 : index
    %25 = vector.load %arg9[%c0_19, %c0_20, %c0_21] : memref<1x8x256xf32, #tpu.memory_space<vmem>>, vector<1x8x256xf32>
    %26 = vector.shape_cast %25 : vector<1x8x256xf32> to vector<8x256xf32>
    %27 = vector.shape_cast %24 : vector<8x256xf32> to vector<1x8x256xf32>
    tpu.vector_store %arg9[%c0_19, %c0_20, %c0_21], %27 {strides = array<i32>} : memref<1x8x256xf32, #tpu.memory_space<vmem>>, vector<1x8x256xf32>,
    return
  }
  func.func @transform_0(%arg0: i32, %arg1: i32) -> (i32, i32, i32) {
    %c0_i32 = arith.constant 0 : i32
    %c0_i32_0 = arith.constant 0 : i32
    return %arg0, %c0_i32, %arg1 : i32, i32, i32
  }
  func.func @transform_1(%arg0: i32, %arg1: i32) -> (i32, i32, i32) {
    %c0_i32 = arith.constant 0 : i32
    %c0_i32_0 = arith.constant 0 : i32
    return %arg0, %c0_i32, %arg1 : i32, i32, i32
  }
  func.func @transform_2(%arg0: i32, %arg1: i32) -> (i32, i32) {
    %c0_i32 = arith.constant 0 : i32
    %c0_i32_0 = arith.constant 0 : i32
    %c0_i32_1 = arith.constant 0 : i32
    return %c0_i32, %c0_i32_0 : i32, i32
  }
  func.func @transform_3(%arg0: i32, %arg1: i32) -> (i32, i32) {
    %c0_i32 = arith.constant 0 : i32
    %c0_i32_0 = arith.constant 0 : i32
    %c0_i32_1 = arith.constant 0 : i32
    return %c0_i32, %c0_i32_0 : i32, i32
  }
  func.func @transform_4(%arg0: i32, %arg1: i32) -> (i32, i32) {
    %c0_i32 = arith.constant 0 : i32
    %c0_i32_0 = arith.constant 0 : i32
    %c0_i32_1 = arith.constant 0 : i32
    return %c0_i32, %c0_i32_0 : i32, i32
  }
  func.func @transform_5(%arg0: i32, %arg1: i32) -> (i32, i32) {
    %c0_i32 = arith.constant 0 : i32
    %c0_i32_0 = arith.constant 0 : i32
    %c0_i32_1 = arith.constant 0 : i32
    return %c0_i32, %c0_i32_0 : i32, i32
  }
  func.func @transform_6(%arg0: i32, %arg1: i32) -> (i32, i32) {
    %c0_i32 = arith.constant 0 : i32
    %c0_i32_0 = arith.constant 0 : i32
    %c0_i32_1 = arith.constant 0 : i32
    return %c0_i32, %c0_i32_0 : i32, i32
  }
  func.func @transform_7(%arg0: i32, %arg1: i32) -> (i32, i32, i32) {
    %c0_i32 = arith.constant 0 : i32
    %c0_i32_0 = arith.constant 0 : i32
    return %arg0, %c0_i32, %arg1 : i32, i32, i32
  }
}

</mosaic_0001>

<bundles_post_ra>
// kernel: attention_gate_forward.1
= control target key start
LH: loop header
LB: loop body
LE: loop exit
PB: predicated region body
PF: predicated region fallthrough
CT: control target
= control target key end

     0   :  { %s853_s24 = smov 0   ;;  %s855_s25 = smov 0   ;;  %s914_s0 = inlined_call_operand.vmem [shape: f32[2,4,256], index: 0, kind: input, shape index: {}]   ;;  %s915_s1 = inlined_call_operand.vmem [shape: f32[2,8,256], index: 1, kind: input, shape index: {}]   ;;  %s916_s2 = inlined_call_operand.vmem [shape: f32[8,4], index: 2, kind: input, shape index: {}]   ;;  %s917_s3 = inlined_call_operand.vmem [shape: f32[8,8], index: 3, kind: input, shape index: {}]   ;;  %s918_s4 = inlined_call_operand.vmem [shape: f32[8,1], index: 4, kind: input, shape index: {}]   ;;  %s919_s5 = inlined_call_operand.vmem [shape: f32[8,8], index: 5, kind: input, shape index: {}]   ;;  %s920_s6 = inlined_call_operand.vmem [shape: f32[8,1], index: 6, kind: input, shape index: {}]   ;;  %s921_s7 = inlined_call_operand.vmem [shape: f32[2,8,256], index: 7, kind: output, shape index: {}]  }
   0x1   :  { %s857_s26 = smov 0  }
   0x2 LB: > { %s29_s27 = sadd.s32 1, %s805_s25  ;;  %p732_p0 = scmp.ge.s32.totalorder %s809_s26, 1  ;;  %s809_s26 = sphi %s857_s26, %s17_s26   ;;  %s805_s25 = sphi %s855_s25, %s923_s25   ;;  %s801_s24 = sphi %s853_s24, %s922_s24  }
   0x3   : > { %p31_p1 = scmp.ge.s32.totalorder %s29_s27, 2  ;;  %p275_p2 = scmp.lt.s32.totalorder %s809_s26, 3 }
   0x5   : > { %s925_s27 = smov (%p31_p1, %s29_s27), 0  ;;  %p276_p3 = pnand %p732_p0, %p275_p2 }
   0x6   : > { %p325_p4 = scmp.lt.s32.totalorder (!%p276_p3), %s801_s24, 1 }
   0x7   : > { %279 = sbr.rel (%p276_p3) target bundleno = 456 (0x1c8), region = 48 }
   0xc   : > { %v811_v0 = vmov 0.0   ;;  %v516_v1 = vld [vmem:[%s918_s4] sm:$0xff]  ;;  %s927_s24 = smov (!%p325_p4, %s801_s24), 1  ;;  %v812_v2 = vmov 0   ;;  %vm359_vm0 = vcmask 64512   ;;  %vm440_vm1 = vcmask 1043456  }
   0xd   : > { %427 = vmatprep.mubr.f32.mxu0 %v811_v0  ;;  %509 = vmatprep.mubr.f32.mxu1 %v811_v0  ;;  %s749_s30 = sshll.u32 %s927_s24, 4  ;;  %s748_s8 = sshll.u32 %s927_s24, 3  ;;  %v527_v3 = vld [vmem:[%s920_s6] sm:$0xff]  ;;  %vm436_vm2 = vcmask 31744  }
   0xe   : > { %777 = vset.pattern.permute.xlu0 %v812_v2  ;;  %s342_s13 = scalar_lea.vmem %s915_s1, %s749_s30  ;;  %v358_v6 = vld [vmem:[%s917_s3] sm:$0xff]  ;;  %s332_s18 = scalar_lea.vmem %s914_s0, %s748_s8 }
   0xf   : > { %519 = vperm.xlu0 %777, %v516_v1   ;;  %v356_v4 = vld [vmem:[%s342_s13 + $0x8] sm:$0xff]  ;;  %v355_v5 = vld [vmem:[%s342_s13] sm:$0xff]  ;;  %s352_s29 = scalar_lea.vmem %s921_s7, %s749_s30 }
  0x10   : > { %393 = vmatprep.subr.mxu0 %v356_v4  ;;  %v354_v7 = vld [vmem:[%s332_s18] sm:$0xff] }
  0x11   : > { %394 = vmatpush1.msra.mxu0 %v355_v5  ;;  %v435_v8 = vcombine.high %v354_v7, %v354_v7  ;;  %v357_v9 = vld [vmem:[%s916_s2] sm:$0xff] }
  0x12   : > { %739 = vmatmul.mubr.msk.f32.vlgmr.msra.gmra.mxu0 %vm359_vm0, %v358_v6  ;;  %v526_v21 = vld [vmem:[%s919_s5] sm:$0xff] }
  0x13   : > { %530 = vperm.xlu0 %777, %v527_v3   ;;  %740 = vmatprep.subr.msk.mxu1 %vm440_vm1, %v435_v8 }
  0x14   : > { %600 = vmatprep.mubr.f32.mxu0 %v811_v0  ;;  %741 = vmatpush1.msk.msra.mxu1 %vm440_vm1, %v354_v7 }
  0x15   : > { %742 = vmatmul.mubr.msk.f32.vlgmr.msra.gmra.mxu1 %vm436_vm2, %v357_v9 }
  0x8a   : > { %v520_v15 = vpop.permute.xlu0 %519 }
  0x8e   : > { %v531_v22 = vpop.permute.xlu0 %530 }
  0xd2   : > { %v429_v10 = vpop.f32.mrf.mxu0 }
  0xd4   : > { %v431_v13 = vpop.f32.mrf.mxu0 }
  0xd5   : > { %v511_v11 = vpop.f32.mrf.mxu1 }
  0xd6   : > { %v512_v12 = vadd.f32 %v511_v11, %v429_v10 }
  0xd7   : > { %v513_v14 = vpop.f32.mrf.mxu1 }
  0xd8   : > { %v514_v16 = vadd.f32 %v513_v14, %v431_v13  ;;  %v522_v17 = vadd.f32 %v520_v15, %v512_v12 }
  0xda   : > { %v523_v18 = vadd.f32 %v520_v15, %v514_v16  ;;  %v524_v20 = vmax.f32 %v522_v17, 0.0 }
  0xdc   : > { %v525_v19 = vmax.f32 %v523_v18, 0.0 }
  0xde   : > { %566 = vmatprep.subr.mxu0 %v525_v19 }
  0xdf   : > { %567 = vmatpush1.msra.mxu0 %v524_v20 }
  0xe0   : > { %743 = vmatmul.mubr.msk.f32.vlgmr.msra.gmra.mxu0 %vm359_vm0, %v526_v21 }
 0x1a0   : > { %v602_v23 = vpop.f32.mrf.mxu0 }
 0x1a1   : > { %v603_v24 = vadd.f32 %v602_v23, %v531_v22 }
 0x1a2   : > { %v604_v25 = vpop.f32.mrf.mxu0 }
 0x1a3   : > { %v744_v26 = vmul.f32 -1.442695, %v603_v24  ;;  %v605_v27 = vadd.f32 %v604_v25, %v531_v22 }
 0x1a5   : > { %779 = vpow2.f32 %v744_v26  ;;  %v745_v28 = vmul.f32 -1.442695, %v605_v27 }
 0x1a7   : > { %781 = vpow2.f32 %v745_v28 }
 0x1b2   : > { %v780_v29 = vpop.eup %779 }
 0x1b3   : > { %v613_v30 = vadd.f32 1.0, %v780_v29 }
 0x1b4   : > { %v782_v31 = vpop.eup %781 }
 0x1b5   : > { %783 = vrcp.f32 %v613_v30  ;;  %v614_v32 = vadd.f32 1.0, %v782_v31 }
 0x1b7   : > { %785 = vrcp.f32 %v614_v32 }
 0x1c2   : > { %v784_v33 = vpop.eup %783 }
 0x1c3   : > { %v619_v34 = vmul.f32 %v784_v33, %v355_v5 }
 0x1c4   : > { %v786_v35 = vpop.eup %785 }
 0x1c5   : > { %621 = vst [vmem:[%s352_s29] sm:$0xff] %v619_v34  ;;  %v620_v36 = vmul.f32 %v786_v35, %v356_v4 }
 0x1c7   : > { %622 = vst [vmem:[%s352_s29 + $0x8] sm:$0xff] %v620_v36 }
 0x1c8 PF: > { %s17_s26 = sadd.s32 1, %s809_s26   ;;  %s922_s24 = smov %s805_s25 }
 0x1c9   : > { %p14_p5 = scmp.ge.s32.totalorder %s17_s26, 4   ;;  %s923_s25 = smov %s925_s27 }
 0x1cb   :  { %16 = sbr.rel (!%p14_p5) target bundleno = 2 (0x2), region = 81 }

</bundles_post_ra>
